<compile_context>
chip_gen: v7x
topology: tpu7x:2x2x1
jax: 0.10.0
libtpu: 0.0.40
codegen_flags: <defaults>
</compile_context>

<pallas_src>
import functools
import math

import jax
import jax.numpy as jnp
from jax.experimental import pallas as pl
from jax.experimental.pallas import tpu as pltpu


def _round_up(x: int, m: int) -> int:
    return (x + m - 1) // m * m


def _gfp_fused_kernel(t_ref, freq_ref, phase_ref, wcat_ref, bcat_ref, out_ref,
                      *, mxu_dtype):
    # t_ref:     [TB, 1]        f32  (timesteps, zero-padded rows past B)
    # freq_ref:  [1, K_pad]     f32  (2*pi * W duplicated [sin|cos], 0 padding)
    # phase_ref: [1, K_pad]     f32  (0 for sin lanes, pi/2 for cos lanes)
    # wcat_ref:  [K_pad, N_pad] f32  (fused [W0.T | W1.T | 0...] weight slab)
    # bcat_ref:  [1, N_pad]     f32  (fused [b0 | b1 | 0...] bias row)
    # out_ref:   [TB, N_pad]    f32  (fused SiLU(linear) output slab)
    t = t_ref[...]                                            # [TB, 1]

    # Gaussian Fourier projection with a single transcendental per element:
    #   lanes [0, half)   -> sin(2*pi*t*W)        (phase 0)
    #   lanes [half, E)   -> sin(2*pi*t*W + pi/2) == cos(2*pi*t*W)
    #   lanes [E, K_pad)  -> sin(0) == 0          (freq 0, phase 0; weight rows 0)
    gfp = jnp.sin(t * freq_ref[...] + phase_ref[...])         # [TB, K_pad]

    # One lane-dense fused matmul (MXU, f32 accumulate) + bias.
    w = wcat_ref[...]
    if mxu_dtype == jnp.bfloat16:
        # v5e option: single-pass bf16 MXU (gated; does not meet 2e-5 atol).
        h = jnp.dot(gfp.astype(jnp.bfloat16), w.astype(jnp.bfloat16),
                    preferred_element_type=jnp.float32)
    else:
        h = jnp.dot(gfp, w, preferred_element_type=jnp.float32,
                    precision=jax.lax.Precision.HIGHEST)
    h = h + bcat_ref[...]                                     # [TB, N_pad]

    # SiLU via tanh: sigmoid(h) = 0.5*(1 + tanh(0.5*h)) -> one EUP op, no divide.
    out_ref[...] = h * (0.5 * (1.0 + jnp.tanh(0.5 * h)))


def pack_params(w_gfp, w0, b0, w1=None, b1=None):
    """One-time packing of module parameters into lane/sublane-padded slabs.

    PyTorch convention: w0 [E, E] (out, in), b0 [E], w1 [1, E] (out, in), b1 [1].
    Returns (freq_row [1, K_pad], phase_row [1, K_pad],
             w_cat [K_pad, N_pad], b_cat [1, N_pad]).
    """
    E = w0.shape[0]
    half = E // 2
    k_pad = _round_up(E, 128)
    n_out = E + (1 if w1 is not None else 0)
    # NOTE: when E % 128 == 0 the scalar deg-1 head costs a whole extra
    # 128-lane block per row.  TODO(synk): pack the deg-1 column into a spare
    # lane of the E block when E % 128 != 0 is not available.
    n_pad = _round_up(n_out, 128)

    w_gfp = w_gfp.astype(jnp.float32) * (2.0 * math.pi)       # fold 2*pi in
    freq = jnp.zeros((1, k_pad), jnp.float32)
    freq = freq.at[0, :half].set(w_gfp)
    freq = freq.at[0, half:E].set(w_gfp)

    phase = jnp.zeros((1, k_pad), jnp.float32)
    phase = phase.at[0, half:E].set(0.5 * math.pi)            # cos = sin(x+pi/2)

    w_cat = jnp.zeros((k_pad, n_pad), jnp.float32)
    w_cat = w_cat.at[:E, :E].set(jnp.transpose(w0).astype(jnp.float32))
    b_cat = jnp.zeros((1, n_pad), jnp.float32)
    b_cat = b_cat.at[0, :E].set(b0.astype(jnp.float32))
    if w1 is not None:
        w_cat = w_cat.at[:E, E].set(w1.reshape(-1).astype(jnp.float32))
        b_cat = b_cat.at[0, E].set(b1.reshape(()).astype(jnp.float32))
    return freq, phase, w_cat, b_cat


@functools.partial(jax.jit,
                   static_argnames=("embed_dim", "use_deg1", "use_bf16_mxu"))
def gfp_linear_apply(t, freq, phase, w_cat, b_cat, *, embed_dim,
                     use_deg1=True, use_bf16_mxu=False):
    """Fused forward: {'0': SiLU(linear0(GFP(t))), '1': SiLU(linear1(GFP(t)))}."""
    B = t.shape[0]
    E = embed_dim
    k_pad, n_pad = w_cat.shape

    # Batch tile: multiple of 8 sublanes, capped at 2048 rows per grid step
    # (per-step overhead ~0.35us dominates this tiny kernel for big B).
    tb = min(2048, _round_up(max(B, 1), 8))
    b_pad = _round_up(max(B, 1), tb)
    # v7x megacore: a single huge step leaves one TensorCore idle; split it.
    if b_pad // tb == 1 and tb >= 1024:
        tb = _round_up(pl.cdiv(tb, 2), 8)
        b_pad = _round_up(max(B, 1), tb)
    grid = (b_pad // tb,)

    t2 = jnp.zeros((b_pad, 1), jnp.float32).at[:B, 0].set(t.astype(jnp.float32))

    # Constant weight slab: single-buffer once it is big enough to matter
    # (saves VMEM under v7x's 64 MiB budget; harmless no-op for small E).
    w_map = lambda i: (0, 0)
    if 4 * k_pad * n_pad >= (4 << 20):
        w_spec = pl.BlockSpec((k_pad, n_pad), w_map,
                              pipeline_mode=pl.Buffered(1))
    else:
        w_spec = pl.BlockSpec((k_pad, n_pad), w_map)

    mxu_dtype = jnp.bfloat16 if use_bf16_mxu else jnp.float32
    kernel = functools.partial(_gfp_fused_kernel, mxu_dtype=mxu_dtype)

    out = pl.pallas_call(
        kernel,
        out_shape=jax.ShapeDtypeStruct((b_pad, n_pad), jnp.float32),
        grid_spec=pltpu.PrefetchScalarGridSpec(
            num_scalar_prefetch=0,
            grid=grid,
            in_specs=[
                pl.BlockSpec((tb, 1), lambda i: (i, 0)),         # t tile
                pl.BlockSpec((1, k_pad), lambda i: (0, 0)),      # freqs (resident)
                pl.BlockSpec((1, k_pad), lambda i: (0, 0)),      # phases (resident)
                w_spec,                                          # fused weights
                pl.BlockSpec((1, n_pad), lambda i: (0, 0)),      # fused bias
            ],
            out_specs=pl.BlockSpec((tb, n_pad), lambda i: (i, 0)),
        ),
        compiler_params=pltpu.CompilerParams(
            dimension_semantics=("parallel",)),
        cost_estimate=pl.CostEstimate(
            flops=2 * b_pad * k_pad * n_pad + 6 * b_pad * n_pad
                  + 2 * b_pad * k_pad,
            transcendentals=b_pad * k_pad + b_pad * n_pad,
            bytes_accessed=4 * (b_pad + 2 * k_pad + k_pad * n_pad
                                + n_pad + b_pad * n_pad),
        ),
    )(t2, freq, phase, w_cat, b_cat)

    # Lazy slices (XLA fuses these); callers that keep chaining fused ops can
    # instead consume the padded slab directly with E as metadata.
    result = {'0': out[:B, :E]}
    if use_deg1:
        result['1'] = out[:B, E:E + 1]
    return result


def gaussian_fourier_projection_linear(t, w_gfp, w0, b0, w1=None, b1=None):
    """Convenience wrapper matching the PyTorch module signature.

    For repeated calls, call pack_params() once and reuse gfp_linear_apply().
    """
    freq, phase, w_cat, b_cat = pack_params(w_gfp, w0, b0, w1, b1)
    return gfp_linear_apply(t, freq, phase, w_cat, b_cat,
                            embed_dim=w0.shape[0], use_deg1=w1 is not None)


def _reference(t, w_gfp, w0, b0, w1, b1):
    """Pure-JAX reference mirroring the PyTorch forward exactly."""
    x_proj = t[:, None] * w_gfp[None, :] * 2.0 * math.pi
    gfp = jnp.concatenate([jnp.sin(x_proj), jnp.cos(x_proj)], axis=-1)
    h0 = gfp @ w0.T + b0
    h1 = gfp @ w1.T + b1
    silu = lambda x: x * jax.nn.sigmoid(x)
    return {'0': silu(h0), '1': silu(h1)}


if __name__ == "__main__":
    B = 8            # number of timesteps in the batch
    E = 32           # embed_dim
    scale = 30.0

    key = jax.random.PRNGKey(0)
    k_w, k_w0, k_b0, k_w1, k_b1, k_t = jax.random.split(key, 6)

    # Deterministic parameter init (shapes from the module's __init__).
    w_gfp = jax.random.normal(k_w, (E // 2,), dtype=jnp.float32) * scale   # GFP.W
    w0 = jax.random.normal(k_w0, (E, E), dtype=jnp.float32) * 0.1          # linear0.weight
    b0 = jax.random.normal(k_b0, (E,), dtype=jnp.float32) * 0.1            # linear0.bias
    w1 = jax.random.normal(k_w1, (1, E), dtype=jnp.float32) * 0.1          # linear1.weight
    b1 = jax.random.normal(k_b1, (1,), dtype=jnp.float32) * 0.1            # linear1.bias

    t = jax.random.uniform(k_t, (B,), dtype=jnp.float32)                   # timesteps

    # Pack weights once (hoisted off the hot path), then run the fused kernel.
    freq, phase, w_cat, b_cat = pack_params(w_gfp, w0, b0, w1, b1)
    out = gfp_linear_apply(t, freq, phase, w_cat, b_cat,
                           embed_dim=E, use_deg1=True)
    jax.block_until_ready(out)

    ref = _reference(t, w_gfp, w0, b0, w1, b1)
    assert out['0'].shape == (B, E) and out['1'].shape == (B, 1)
    assert jnp.allclose(out['0'], ref['0'], atol=2e-5, rtol=1e-5)
    assert jnp.allclose(out['1'], ref['1'], atol=2e-5, rtol=1e-5)

    print("KERNEL_OK")
</pallas_src>

<mosaic_0001>
module attributes {stable_mosaic.version = 11 : i64} {
  func.func @_gfp_fused_kernel(%arg0: i32, %arg1: memref<8x1xf32, #tpu.memory_space<vmem>>, %arg2: memref<1x128xf32, #tpu.memory_space<vmem>>, %arg3: memref<1x128xf32, #tpu.memory_space<vmem>>, %arg4: memref<128x128xf32, #tpu.memory_space<vmem>>, %arg5: memref<1x128xf32, #tpu.memory_space<vmem>>, %arg6: memref<8x128xf32, #tpu.memory_space<vmem>>) attributes {dimension_semantics = [#tpu.dimension_semantics<parallel>], iteration_bounds = array<i64: 1>, scalar_prefetch = 0 : i64, scratch_operands = 0 : i64, tpu.core_type = #tpu.core_type<tc>, window_params = [{transform_indices = @transform_0, window_bounds = array<i64: 8, 1>}, {pipeline_mode = #tpu.pipeline_mode<synchronous>, transform_indices = @transform_1, window_bounds = array<i64: 1, 128>}, {pipeline_mode = #tpu.pipeline_mode<synchronous>, transform_indices = @transform_2, window_bounds = array<i64: 1, 128>}, {pipeline_mode = #tpu.pipeline_mode<synchronous>, transform_indices = @transform_3, window_bounds = array<i64: 128, 128>}, {pipeline_mode = #tpu.pipeline_mode<synchronous>, transform_indices = @transform_4, window_bounds = array<i64: 1, 128>}, {transform_indices = @transform_5, window_bounds = array<i64: 8, 128>}]} {
    %c0 = arith.constant 0 : index
    %c0_0 = arith.constant 0 : index
    %0 = vector.load %arg1[%c0, %c0_0] : memref<8x1xf32, #tpu.memory_space<vmem>>, vector<8x1xf32>
    %c0_1 = arith.constant 0 : index
    %c0_2 = arith.constant 0 : index
    %1 = vector.load %arg2[%c0_1, %c0_2] : memref<1x128xf32, #tpu.memory_space<vmem>>, vector<1x128xf32>
    %2 = vector.broadcast %0 : vector<8x1xf32> to vector<8x128xf32>
    %3 = vector.broadcast %1 : vector<1x128xf32> to vector<8x128xf32>
    %4 = arith.mulf %2, %3 : vector<8x128xf32>
    %c0_3 = arith.constant 0 : index
    %c0_4 = arith.constant 0 : index
    %5 = vector.load %arg3[%c0_3, %c0_4] : memref<1x128xf32, #tpu.memory_space<vmem>>, vector<1x128xf32>
    %6 = vector.broadcast %5 : vector<1x128xf32> to vector<8x128xf32>
    %7 = arith.addf %4, %6 : vector<8x128xf32>
    %8 = math.sin %7 : vector<8x128xf32>
    %c0_5 = arith.constant 0 : index
    %c0_6 = arith.constant 0 : index
    %9 = vector.load %arg4[%c0_5, %c0_6] : memref<128x128xf32, #tpu.memory_space<vmem>>, vector<128x128xf32>
    %cst = arith.constant dense<0.000000e+00> : vector<8x128xf32>
    %10 = tpu.matmul %8, %9, %cst {dimension_numbers = #tpu.dot_dimension_numbers<[1], [0], [0], [1], [0, 0, 1, 1], [], []>, precision = #tpu.contract_precision<fp32>} : vector<8x128xf32>, vector<128x128xf32>, vector<8x128xf32> -> vector<8x128xf32>
    %c0_7 = arith.constant 0 : index
    %c0_8 = arith.constant 0 : index
    %11 = vector.load %arg5[%c0_7, %c0_8] : memref<1x128xf32, #tpu.memory_space<vmem>>, vector<1x128xf32>
    %12 = vector.broadcast %11 : vector<1x128xf32> to vector<8x128xf32>
    %13 = arith.addf %10, %12 : vector<8x128xf32>
    %cst_9 = arith.constant 5.000000e-01 : f32
    %14 = vector.broadcast %cst_9 : f32 to vector<8x128xf32>
    %15 = arith.mulf %14, %13 : vector<8x128xf32>
    %16 = math.tanh %15 : vector<8x128xf32>
    %cst_10 = arith.constant 1.000000e+00 : f32
    %17 = vector.broadcast %cst_10 : f32 to vector<8x128xf32>
    %18 = arith.addf %17, %16 : vector<8x128xf32>
    %cst_11 = arith.constant 5.000000e-01 : f32
    %19 = vector.broadcast %cst_11 : f32 to vector<8x128xf32>
    %20 = arith.mulf %19, %18 : vector<8x128xf32>
    %21 = arith.mulf %13, %20 : vector<8x128xf32>
    %c0_12 = arith.constant 0 : index
    %c0_13 = arith.constant 0 : index
    %22 = vector.load %arg6[%c0_12, %c0_13] : memref<8x128xf32, #tpu.memory_space<vmem>>, vector<8x128xf32>
    tpu.vector_store %arg6[%c0_12, %c0_13], %21 {strides = array<i32>} : memref<8x128xf32, #tpu.memory_space<vmem>>, vector<8x128xf32>,
    return
  }
  func.func @transform_0(%arg0: i32) -> (i32, i32) {
    %c0_i32 = arith.constant 0 : i32
    %c0_i32_0 = arith.constant 0 : i32
    return %arg0, %c0_i32 : i32, i32
  }
  func.func @transform_1(%arg0: i32) -> (i32, i32) {
    %c0_i32 = arith.constant 0 : i32
    %c0_i32_0 = arith.constant 0 : i32
    %c0_i32_1 = arith.constant 0 : i32
    return %c0_i32, %c0_i32_0 : i32, i32
  }
  func.func @transform_2(%arg0: i32) -> (i32, i32) {
    %c0_i32 = arith.constant 0 : i32
    %c0_i32_0 = arith.constant 0 : i32
    %c0_i32_1 = arith.constant 0 : i32
    return %c0_i32, %c0_i32_0 : i32, i32
  }
  func.func @transform_3(%arg0: i32) -> (i32, i32) {
    %c0_i32 = arith.constant 0 : i32
    %c0_i32_0 = arith.constant 0 : i32
    %c0_i32_1 = arith.constant 0 : i32
    return %c0_i32, %c0_i32_0 : i32, i32
  }
  func.func @transform_4(%arg0: i32) -> (i32, i32) {
    %c0_i32 = arith.constant 0 : i32
    %c0_i32_0 = arith.constant 0 : i32
    %c0_i32_1 = arith.constant 0 : i32
    return %c0_i32, %c0_i32_0 : i32, i32
  }
  func.func @transform_5(%arg0: i32) -> (i32, i32) {
    %c0_i32 = arith.constant 0 : i32
    %c0_i32_0 = arith.constant 0 : i32
    return %arg0, %c0_i32 : i32, i32
  }
}

</mosaic_0001>

<bundles_post_ra>
// kernel: gfp_linear_apply.1
= control target key start
LH: loop header
LB: loop body
LE: loop exit
PB: predicated region body
PF: predicated region fallthrough
CT: control target
= control target key end

     0   :  { %10 = vsyncpa [#allocation3], 0  ;;  %s1356_s18 = smov [#allocation2]   ;;  %s1710_s0 = inlined_call_operand.vmem [shape: f32[8,1], index: 0, kind: input, shape index: {}]   ;;  %s1711_s1 = inlined_call_operand.vmem [shape: f32[1,128], index: 1, kind: input, shape index: {}]   ;;  %s1712_s2 = inlined_call_operand.vmem [shape: f32[1,128], index: 2, kind: input, shape index: {}]   ;;  %s1713_s3 = inlined_call_operand.hbm [shape: f32[128,128], index: 3, kind: input, shape index: {}]   ;;  %s1714_s4 = inlined_call_operand.vmem [shape: f32[1,128], index: 4, kind: input, shape index: {}]   ;;  %s1715_s5 = inlined_call_operand.vmem [shape: f32[8,128], index: 5, kind: output, shape index: {}]  }
   0x1   :  { %s22_s19 = sshll.u32 %s1356_s18, 4  ;;  %s1332_s22 = scalar_lea.hbm %s1713_s3, 2048  ;;  %s23_s19 = int_to_ptr.vmem [resolvable:$true] %s22_s19 }
   0x2   :  { %p1333_p0 = scmp.ne.s32.totalorder %s1713_s3, %s1332_s22  ;;  %p1336_p1 = scmp.lt.u32.totalorder %s1332_s22, %s1713_s3 }
   0x4   :  { %p1338_p2 = pnand %p1336_p1, %p1333_p0 }
   0x6   :  { %1341 = shalt.err (!%p1338_p2)
}
   0x7   :  { %s1342_s27 = scalar_lea.vmem %s23_s19, 2048  ;;  %p1347_p4 = scmp.lt.s32.totalorder %s23_s19, %s23_s19 }
   0x8   :  { %p1343_p3 = scmp.ne.s32.totalorder %s23_s19, %s1342_s27  ;;  %p1348_p5 = scmp.lt.s32.totalorder %s1342_s27, %s1342_s27 }
   0xa   :  { %p1349_p6 = por %p1348_p5, %p1347_p4 }
   0xc   :  { %p1350_p7 = pnand %p1349_p6, %p1343_p3 }
   0xe   :  { %1353 = shalt.err (!%p1350_p7)
}
   0xf   :  { %s1357_s28 = smov 128   ;;  %s1358_s29 = smov 8  }
  0x10   :  { %28 = dma.hbm_to_vmem [thread:$0]  %s1713_s3, 2048, %s23_s19, [#allocation3], %s1357_s28, %s1357_s28, %s1358_s29  }
  0x11   :  { %1354 = dma.done.wait [#allocation3], 2048  }
  0x12   :  { %1355 = vsyncadd [#allocation3], 4294965248  ;;  %v1359_v0 = vmov 0   ;;  %v34_v1 = vld [vmem:[%s1710_s0] sm:$0xff]  ;;  %v161_v3 = vld [vmem:[#allocation2 + $0x8] sm:$0xff]  ;;  %v1716_v7 = vmov 0.0|0.0  }
  0x13   :  { %1325 = vset.pattern.permute.xlu0 %v1359_v0  ;;  %v160_v2 = vld [vmem:[#allocation2] sm:$0xff]  ;;  %v187_v5 = vand.u32 4294901760, %v161_v3  ;;  %1226 = vmatprep.subr.bf16.mxu0 %v1716_v7  ;;  %v162_v8 = vld [vmem:[#allocation2 + $0x10] sm:$0xff]  ;;  %v163_v9 = vld [vmem:[#allocation2 + $0x18] sm:$0xff]  ;;  %vm1361_vm0 = vmmov 0   ;;  %v1718_v57 = vmov 0.0  }
  0x14   :  { %38 = vperm.xlu0 %1325, %v34_v1   ;;  %v184_v4 = vand.u32 4294901760, %v160_v2  ;;  %1154 = vmatprep.subr.bf16.mxu1 %v1716_v7  ;;  %v190_v10 = vand.u32 4294901760, %v162_v8  ;;  %v193_v11 = vand.u32 4294901760, %v163_v9  ;;  %v164_v13 = vld [vmem:[#allocation2 + $0x20] sm:$0xff]  ;;  %v165_v14 = vld [vmem:[#allocation2 + $0x28] sm:$0xff]  ;;  %v166_v18 = vld [vmem:[#allocation2 + $0x30] sm:$0xff] }
  0x15   :  { %v196_v15 = vand.u32 4294901760, %v164_v13  ;;  %v199_v16 = vand.u32 4294901760, %v165_v14  ;;  %v167_v19 = vld [vmem:[#allocation2 + $0x38] sm:$0xff]  ;;  %v202_v20 = vand.u32 4294901760, %v166_v18  ;;  %v1434_v23 = vsub.f32 %v161_v3, %v187_v5  ;;  %v168_v26 = vld [vmem:[#allocation2 + $0x40] sm:$0xff]  ;;  %v169_v27 = vld [vmem:[#allocation2 + $0x48] sm:$0xff]  ;;  %1081 = vmatprep.mubr.msk.f32.mxu0 %vm1361_vm0, %v1718_v57  ;;  %976 = vmatprep.mubr.msk.f32.mxu1 %vm1361_vm0, %v1718_v57 }
  0x16   :  { %v1414_v6 = vpack.c.bf16 %v187_v5, %v184_v4  ;;  %v1422_v12 = vpack.c.bf16 %v193_v11, %v190_v10  ;;  %v205_v21 = vand.u32 4294901760, %v167_v19  ;;  %v1432_v22 = vsub.f32 %v160_v2, %v184_v4  ;;  %v170_v28 = vld [vmem:[#allocation2 + $0x50] sm:$0xff]  ;;  %v171_v33 = vld [vmem:[#allocation2 + $0x58] sm:$0xff]  ;;  %v172_v34 = vld [vmem:[#allocation2 + $0x60] sm:$0xff] }
  0x17   :  { %v1428_v17 = vpack.c.bf16 %v199_v16, %v196_v15  ;;  %v1436_v24 = vsub.f32 %v162_v8, %v190_v10  ;;  %v1438_v25 = vsub.f32 %v163_v9, %v193_v11  ;;  %v1441_v29 = vsub.f32 %v164_v13, %v196_v15  ;;  %v173_v35 = vld [vmem:[#allocation2 + $0x68] sm:$0xff]  ;;  %v174_v39 = vld [vmem:[#allocation2 + $0x70] sm:$0xff]  ;;  %v175_v40 = vld [vmem:[#allocation2 + $0x78] sm:$0xff] }
  0x18   :  { %1228 = vmatpush3.bf16.msra.mxu0 %v1414_v6  ;;  %1156 = vmatpush3.bf16.msra.mxu1 %v1414_v6  ;;  %v1443_v30 = vsub.f32 %v165_v14, %v199_v16  ;;  %v1445_v31 = vpack.c.bf16 %v205_v21, %v202_v20  ;;  %v1447_v32 = vsub.f32 %v166_v18, %v202_v20  ;;  %v208_v37 = vand.u32 4294901760, %v168_v26 }
  0x19   :  { %1229 = vmatprep.subr.bf16.mxu0 %v1716_v7  ;;  %1157 = vmatprep.subr.bf16.mxu1 %v1716_v7  ;;  %v1450_v36 = vsub.f32 %v167_v19, %v205_v21  ;;  %v211_v38 = vand.u32 4294901760, %v169_v27  ;;  %v214_v41 = vand.u32 4294901760, %v170_v28  ;;  %v217_v42 = vand.u32 4294901760, %v171_v33 }
  0x1a   :  { %v220_v43 = vand.u32 4294901760, %v172_v34  ;;  %v223_v44 = vand.u32 4294901760, %v173_v35  ;;  %v1457_v46 = vsub.f32 %v168_v26, %v208_v37  ;;  %v226_v48 = vand.u32 4294901760, %v174_v39 }
  0x1b   :  { %v1455_v45 = vpack.c.bf16 %v211_v38, %v208_v37  ;;  %v1459_v47 = vsub.f32 %v169_v27, %v211_v38  ;;  %v1462_v49 = vsub.f32 %v170_v28, %v214_v41  ;;  %v1464_v50 = vsub.f32 %v171_v33, %v217_v42 }
  0x1c   :  { %1231 = vmatpush3.bf16.msra.mxu0 %v1422_v12  ;;  %1159 = vmatpush3.bf16.msra.mxu1 %v1422_v12  ;;  %1728 = vst [vmem:[#allocation6_spill] sm:$0xff] %v1457_v46  ;;  %v229_v51 = vand.u32 4294901760, %v175_v40  ;;  %v1466_v52 = vsub.f32 %v172_v34, %v220_v43  ;;  %v1468_v53 = vsub.f32 %v173_v35, %v223_v44  ;;  %v277_v60 = vand.u32 4294901760, %v1432_v22 }
  0x1d   :  { %1232 = vmatprep.subr.bf16.mxu0 %v1716_v7  ;;  %1160 = vmatprep.subr.bf16.mxu1 %v1716_v7  ;;  %1727 = vst [vmem:[#allocation5_spill] sm:$0xff] %v1455_v45  ;;  %1729 = vst [vmem:[#allocation7_spill] sm:$0xff] %v1459_v47  ;;  %v1470_v54 = vsub.f32 %v174_v39, %v226_v48  ;;  %v1474_v55 = vpack.c.bf16 %v217_v42, %v214_v41  ;;  %v284_v61 = vand.u32 4294901760, %v1434_v23  ;;  %v1368_v57 = vmov 1326507024  }
  0x1e   :  { %v1476_v56 = vsub.f32 %v175_v40, %v229_v51  ;;  %v1486_v58 = vpack.c.bf16 %v223_v44, %v220_v43  ;;  %v1492_v59 = vpack.c.bf16 %v229_v51, %v226_v48  ;;  %v278_v63 = vsub.f32 %v1432_v22, %v277_v60 }
  0x1f   :  { %1730 = vst [vmem:[#allocation8_spill] sm:$0xff] %v1474_v55  ;;  %v1502_v62 = vpack.c.bf16 %v284_v61, %v277_v60  ;;  %v285_v0 = vsub.f32 %v1434_v23, %v284_v61  ;;  %v291_v3 = vand.u32 4294901760, %v1436_v24  ;;  %v298_v4 = vand.u32 4294901760, %v1438_v25 }
  0x20   :  { %1234 = vmatpush3.bf16.msra.mxu0 %v1428_v17  ;;  %1162 = vmatpush3.bf16.msra.mxu1 %v1428_v17  ;;  %1731 = vst [vmem:[#allocation9_spill] sm:$0xff] %v1486_v58  ;;  %1732 = vst [vmem:[#allocation10_spill] sm:$0xff] %v1492_v59  ;;  %v279_v1 = vand.u32 4294901760, %v278_v63  ;;  %v305_v14 = vand.u32 4294901760, %v1441_v29  ;;  %v312_v15 = vand.u32 4294901760, %v1443_v30  ;;  %v319_v27 = vand.u32 4294901760, %v1447_v32 }
  0x21   :  { %1235 = vmatprep.subr.bf16.mxu0 %v1716_v7  ;;  %1163 = vmatprep.subr.bf16.mxu1 %v1716_v7  ;;  %v286_v2 = vand.u32 4294901760, %v285_v0  ;;  %v1510_v8 = vpack.c.bf16 %v298_v4, %v291_v3  ;;  %v292_v9 = vsub.f32 %v1436_v24, %v291_v3  ;;  %v299_v10 = vsub.f32 %v1438_v25, %v298_v4 }
  0x22   :  { %v1518_v18 = vpack.c.bf16 %v312_v15, %v305_v14  ;;  %v306_v19 = vsub.f32 %v1441_v29, %v305_v14  ;;  %v313_v20 = vsub.f32 %v1443_v30, %v312_v15  ;;  %v326_v28 = vand.u32 4294901760, %v1450_v36 }
  0x23   :  { %v1508_v5 = vpack.c.bf16 %v286_v2, %v279_v1  ;;  %v293_v11 = vand.u32 4294901760, %v292_v9  ;;  %v300_v13 = vand.u32 4294901760, %v299_v10  ;;  %v320_v35 = vsub.f32 %v1447_v32, %v319_v27 }
  0x24   :  { %1237 = vmatpush3.bf16.msra.mxu0 %v1445_v31  ;;  %1165 = vmatpush3.bf16.msra.mxu1 %v1445_v31  ;;  %v307_v21 = vand.u32 4294901760, %v306_v19  ;;  %v314_v26 = vand.u32 4294901760, %v313_v20  ;;  %v1526_v34 = vpack.c.bf16 %v326_v28, %v319_v27  ;;  %v327_v37 = vsub.f32 %v1450_v36, %v326_v28 }
  0x25   :  { %1238 = vmatprep.subr.bf16.mxu0 %v1716_v7  ;;  %1166 = vmatprep.subr.bf16.mxu1 %v1716_v7  ;;  %v1516_v16 = vpack.c.bf16 %v300_v13, %v293_v11  ;;  %v321_v38 = vand.u32 4294901760, %v320_v35  ;;  %v333_v40 = vand.u32 4294901760, %v1457_v46  ;;  %v340_v41 = vand.u32 4294901760, %v1459_v47 }
  0x26   :  { %v1524_v33 = vpack.c.bf16 %v314_v26, %v307_v21  ;;  %v328_v39 = vand.u32 4294901760, %v327_v37  ;;  %v347_v61 = vand.u32 4294901760, %v1462_v49  ;;  %v354_v63 = vand.u32 4294901760, %v1464_v50 }
  0x27   :  { %v1534_v43 = vpack.c.bf16 %v340_v41, %v333_v40  ;;  %v334_v44 = vsub.f32 %v1457_v46, %v333_v40  ;;  %v341_v48 = vsub.f32 %v1459_v47, %v340_v41  ;;  %v361_v10 = vand.u32 4294901760, %v1466_v52 }
  0x28   :  { %1240 = vmatpush3.bf16.msra.mxu0 %v1455_v45  ;;  %1168 = vmatpush3.bf16.msra.mxu1 %v1455_v45  ;;  %v1532_v42 = vpack.c.bf16 %v328_v39, %v321_v38  ;;  %v1542_v1 = vpack.c.bf16 %v354_v63, %v347_v61  ;;  %v348_v2 = vsub.f32 %v1462_v49, %v347_v61  ;;  %v368_v11 = vand.u32 4294901760, %v1468_v53 }
  0x29   :  { %1241 = vmatprep.subr.bf16.mxu0 %v1716_v7  ;;  %1169 = vmatprep.subr.bf16.mxu1 %v1716_v7  ;;  %v335_v51 = vand.u32 4294901760, %v334_v44  ;;  %v342_v60 = vand.u32 4294901760, %v341_v48  ;;  %v355_v3 = vsub.f32 %v1464_v50, %v354_v63  ;;  %v362_v15 = vsub.f32 %v1466_v52, %v361_v10  ;;  %v835_v44 = vld [vmem:[%s1711_s1] ss:$0 sm:$0xff] }
  0x2a   :  { %v349_v4 = vand.u32 4294901760, %v348_v2  ;;  %v1550_v14 = vpack.c.bf16 %v368_v11, %v361_v10  ;;  %v369_v19 = vsub.f32 %v1468_v53, %v368_v11  ;;  %v375_v26 = vand.u32 4294901760, %v1470_v54  ;;  %v836_v48 = vld [vmem:[%s1712_s2] ss:$0 sm:$0xff] }
  0x2b   :  { %v1540_v0 = vpack.c.bf16 %v342_v60, %v335_v51  ;;  %v356_v9 = vand.u32 4294901760, %v355_v3  ;;  %v363_v20 = vand.u32 4294901760, %v362_v15  ;;  %v382_v27 = vand.u32 4294901760, %v1476_v56 }
  0x2c   :  { %1243 = vmatpush3.bf16.msra.mxu0 %v1474_v55  ;;  %1171 = vmatpush3.bf16.msra.mxu1 %v1474_v55  ;;  %v370_v21 = vand.u32 4294901760, %v369_v19  ;;  %v376_v37 = vsub.f32 %v1470_v54, %v375_v26  ;;  %v1366_v19 = vmov 2102212464   ;;  %v1367_v60 = vmov 920167782  }
  0x2d   :  { %1244 = vmatprep.subr.bf16.mxu0 %v1716_v7  ;;  %1172 = vmatprep.subr.bf16.mxu1 %v1716_v7  ;;  %v1548_v13 = vpack.c.bf16 %v356_v9, %v349_v4  ;;  %v1558_v35 = vpack.c.bf16 %v382_v27, %v375_v26  ;;  %v383_v38 = vsub.f32 %v1476_v56, %v382_v27 }
  0x2e   :  { %v1556_v28 = vpack.c.bf16 %v370_v21, %v363_v20  ;;  %v377_v39 = vand.u32 4294901760, %v376_v37 }
  0x2f   :  { %v384_v40 = vand.u32 4294901760, %v383_v38 }
  0x30   :  { %1246 = vmatpush3.bf16.msra.mxu0 %v1486_v58  ;;  %1174 = vmatpush3.bf16.msra.mxu1 %v1486_v58 }
  0x31   :  { %1247 = vmatprep.subr.bf16.mxu0 %v1716_v7  ;;  %1175 = vmatprep.subr.bf16.mxu1 %v1716_v7  ;;  %v1562_v41 = vpack.c.bf16 %v384_v40, %v377_v39  ;;  %v1363_v40 = vmov 683565275  }
  0x34   :  { %1249 = vmatpush3.bf16.msra.mxu0 %v1492_v59  ;;  %1177 = vmatpush3.bf16.msra.mxu1 %v1492_v59 }
  0x35   :  { %1250 = vmatprep.subr.bf16.mxu0 %v1716_v7  ;;  %1178 = vmatprep.subr.bf16.mxu1 %v1716_v7 }
  0x93   :  { %v39_v51 = vpop.permute.xlu0 %38 }
  0x94   :  { %v47_v61 = vmul.f32 %v835_v44, %v39_v51 }
  0x96   :  { %v1572_v63 = vadd.f32 %v836_v48, %v47_v61  ;;  %v1364_v48 = vmov 2475754826  }
  0x98   :  { %v59_v3 = vand.u32 2139095040, %v1572_v63  ;;  %v1720_v11 = vand.u32 2147483647, %v1572_v63  ;;  %vm58_vm8 = vcmp.lt.s32.totalorder %v1572_v63, 0  ;;  %vm148_vm13 = vweird.f32 %v1572_v63 }
  0x9a   :  { %v60_v4 = vshrl.u32 %v59_v3, 23  ;;  %v63_v20 = vand.u32 8388607, %v1720_v11  ;;  %v1365_v3 = vmov 2131351028  }
  0x9c   :  { %v837_v10 = vadd.s32 4294967169, %v60_v4  ;;  %v64_v38 = vor.u32 8388608, %v63_v20 }
  0x9e   :  { %v66_v15 = vadd.s32 1, %v837_v10 }
  0xa0   :  { %vm67_vm1 = vcmp.gt.s32.totalorder %v66_v15, 0 }
  0xa1   :  { %v68_v21 = vsel %vm67_vm1, %v66_v15, 0 }
  0xa2   :  { %v70_v26 = vand.u32 31, %v68_v21  ;;  %v69_v39 = vshrl.u32 %v68_v21, 5  ;;  %v1218_v21 = vpack.c.bf16 %v1464_v50, %v1462_v49  ;;  %v841_v49 = vld [vmem:[%s1714_s4] ss:$0 sm:$0xff] }
  0xa4   :  { %v71_v37 = vsub.s32 32, %v70_v26  ;;  %v73_v44 = vshll.u32 %v1363_v40, %v70_v26  ;;  %v76_v51 = vshll.u32 %v1364_v48, %v70_v26  ;;  %v79_v10 = vshll.u32 %v1365_v3, %v70_v26 }
  0xa5   :  { %v82_v2 = vshll.u32 %v1366_v19, %v70_v26  ;;  %v85_v7 = vshll.u32 %v1367_v60, %v70_v26  ;;  %vm88_vm2 = vcmp.lt.s32.totalorder %v69_v39, 1  ;;  %vm91_vm3 = vcmp.lt.s32.totalorder %v69_v39, 4 }
  0xa6   :  { %v74_v61 = vshrl.u32 %v1364_v48, %v71_v37  ;;  %v77_v4 = vshrl.u32 %v1365_v3, %v71_v37  ;;  %v80_v9 = vshrl.u32 %v1366_v19, %v71_v37  ;;  %v83_v15 = vshrl.u32 %v1367_v60, %v71_v37 }
  0xa7   :  { %v86_v11 = vshrl.u32 %v1368_v57, %v71_v37  ;;  %v72_v48 = vshrl.u32 %v1363_v40, %v71_v37  ;;  %vm90_vm4 = vcmp.lt.s32.totalorder %v69_v39, 3  ;;  %v1221_v57 = vpack.c.bf16 %v1468_v53, %v1466_v52 }
  0xa8   :  { %v75_v27 = vor.u32 %v74_v61, %v73_v44  ;;  %v78_v59 = vor.u32 %v77_v4, %v76_v51  ;;  %v81_v20 = vor.u32 %v80_v9, %v79_v10  ;;  %v84_v58 = vor.u32 %v83_v15, %v82_v2 }
  0xa9   :  { %v87_v55 = vor.u32 %v86_v11, %v85_v7  ;;  %vm89_vm5 = vcmp.lt.s32.totalorder %v69_v39, 2  ;;  %v104_v26 = vshll.u32 %v64_v38, 8 }
  0xaa   :  { %v93_v3 = vsel %vm91_vm3, %v81_v20, 2102212464  ;;  %v96_v46 = vsel %vm88_vm2, %v75_v27, %v78_v59  ;;  %v100_v47 = vsel %vm88_vm2, %v78_v59, %v81_v20  ;;  %v97_v19 = vsel %vm91_vm3, %v84_v58, 920167782 }
  0xab   :  { %v101_v45 = vsel %vm91_vm3, %v87_v55, 1326507024  ;;  %v98_v60 = vsel %vm90_vm4, %v81_v20, %v97_v19  ;;  %v92_v44 = vsel %vm88_vm2, %v72_v48, %v75_v27  ;;  %v94_v51 = vsel %vm90_vm4, %v78_v59, %v93_v3 }
  0xac   :  { %v102_v9 = vsel %vm90_vm4, %v84_v58, %v101_v45  ;;  %v99_v2 = vsel %vm89_vm5, %v96_v46, %v98_v60  ;;  %v1224_v55 = vpack.c.bf16 %v1476_v56, %v1470_v54  ;;  %v95_v4 = vsel %vm89_vm5, %v92_v44, %v94_v51 }
  0xad   :  { %v103_v7 = vsel %vm89_vm5, %v100_v47, %v102_v9  ;;  %v1593_v37 = vmul.u32.u64.low %v104_v26, %v99_v2  ;;  %v1594_v40 = vmul.u32.u64.high %v104_v26, %v99_v2, %v1593_v37  ;;  %v111_v45 = vmul.u32 %v104_v26, %v95_v4 }
  0xae   :  { %v1590_v11 = vmul.u32.u64.low %v104_v26, %v103_v7  ;;  %v1591_v61 = vmul.u32.u64.high %v104_v26, %v103_v7, %v1590_v11 }
  0xaf   :  { %v114_v39 = vadd.s32 1, %v1594_v40 }
  0xb0   :  { %vm113_vm6 = vc.u32 %v1591_v61, %v1593_v37  ;;  %v112_v19 = vadd.s32 %v1593_v37, %v1591_v61 }
  0xb1   :  { %v115_v58 = vsel %vm113_vm6, %v114_v39, %v1594_v40 }
  0xb2   :  { %v116_v59 = vadd.s32 %v115_v58, %v111_v45 }
  0xb4   :  { %v117_v46 = vadd.s32 536870912, %v116_v59 }
  0xb6   :  { %v118_v47 = vshrl.u32 %v117_v46, 30 }
  0xb8   :  { %v119_v27 = vshll.u32 %v118_v47, 30  ;;  %v142_v45 = vsub.s32 4, %v118_v47 }
  0xba   :  { %v120_v38 = vsub.s32 %v116_v59, %v119_v27  ;;  %v1733_v59 = vand.u32 2147483647, %v1572_v63  ;;  %v143_v61 = vsel %vm58_vm8, %v142_v45, %v118_v47 }
  0xbc   :  { %v122_v10 = vsub.s32 0, %v120_v38  ;;  %vm57_vm9 = vcmp.le.f32.partialorder %v1733_v59, 0.7853982 }
  0xbd   :  { %v145_v27 = vsel %vm57_vm9, 0, %v143_v61 }
  0xbe   :  { %v838_v15 = vmin.u32 %v122_v10, %v120_v38 }
  0xc0   :  { %v124_v20 = vclz %v838_v15 }
  0xc2   :  { %v839_v48 = vadd.s32 4294967294, %v124_v20 }
  0xc4   :  { %vm840_vm7 = vcmp.lt.s32.totalorder %v839_v48, 0 }
  0xc5   :  { %v127_v3 = vsel %vm840_vm7, 0, %v839_v48 }
  0xc6   :  { %v128_v60 = vsub.s32 32, %v127_v3  ;;  %v132_v9 = vsub.s32 4294967266, %v127_v3  ;;  %v129_v44 = vshll.u32 %v120_v38, %v127_v3  ;;  %v149_v38 = vadd.s32 3, %v145_v27 }
  0xc8   :  { %v130_v51 = vshrl.u32 %v112_v19, %v128_v60  ;;  %v133_v26 = vadd.s32 127, %v132_v9  ;;  %v150_v10 = vand.u32 3, %v149_v38 }
  0xca   :  { %v131_v2 = vor.u32 %v130_v51, %v129_v44  ;;  %v134_v7 = vshll.u32 %v133_v26, 23  ;;  %vm155_vm10 = vcmp.eq.s32.totalorder %v150_v10, 2  ;;  %vm152_vm11 = vcmp.eq.s32.totalorder %v150_v10, 0 }
  0xcb   :  { %vm151_vm12 = vcmp.lt.s32.totalorder %v150_v10, 2 }
  0xcc   :  { %v135_v11 = vor.u32 4788187, %v134_v7  ;;  %v138_v4 = vcvt.s32.f32 %v131_v2  ;;  %v1734_v7 = vmov 0.0  }
  0xce   :  { %v136_v40 = vand.u32 2147483647, %v135_v11  ;;  %v1735_v11 = vmov 0.0|0.0  }
  0xd0   :  { %v139_v39 = vmul.f32 %v138_v4, %v136_v40 }
  0xd2   :  { %v140_v58 = vxor.u32 2147483648, %v139_v39 }
  0xd4   :  { %v141_v46 = vsel %vm58_vm8, %v140_v58, %v139_v39 }
  0xd5   :  { %v144_v37 = vsel %vm57_vm9, %v1572_v63, %v141_v46 }
  0xd6   :  { %1326 = vcosq.f32 %v144_v37 }
  0xd7   :  { %1328 = vsinq.f32 %v144_v37 }
  0xe0   :  { %v1327_v15 = vpop.eup %1326 }
  0xe1   :  { %v1329_v20 = vpop.eup %1328  ;;  %v156_v48 = vxor.u32 2147483648, %v1327_v15 }
  0xe2   :  { %v153_v3 = vxor.u32 2147483648, %v1329_v20 }
  0xe3   :  { %v157_v19 = vsel %vm155_vm10, %v156_v48, %v1329_v20 }
  0xe4   :  { %v154_v60 = vsel %vm152_vm11, %v1327_v15, %v153_v3 }
  0xe5   :  { %v158_v9 = vsel %vm151_vm12, %v154_v60, %v157_v19 }
  0xe6   :  { %v159_v47 = vsel %vm148_vm13, nan, %v158_v9 }
  0xe7   :  { %v1607_v44 = vand.u32 4294901760, %v159_v47 }
  0xe9   :  { %v1610_v51 = vsub.f32 %v159_v47, %v1607_v44 }
  0xeb   :  { %v266_v26 = vand.u32 4294901760, %v1610_v51 }
  0xed   :  { %1082 = vmatmul.mubr.f32.vlgmr.msra.gmra.mrb[0].mxu0 %v266_v26  ;;  %v267_v2 = vsub.f32 %v1610_v51, %v266_v26 }
  0xee   :  { %1252 = vmatpush3.bf16.msra.mxu0 %v1502_v62  ;;  %1116 = vmatprep.mubr.msk.f32.mxu0 %vm1361_vm0, %v1734_v7  ;;  %v1736_v62 = vpack.c.bf16 %v1434_v23, %v1432_v22  ;;  %v1739_v22 = vpack.c.bf16 %v1450_v36, %v1447_v32  ;;  %v1740_v23 = vld [vmem:[#allocation5_spill] sm:$0xff] }
  0xef   :  { %1253 = vmatprep.subr.bf16.mxu0 %v1735_v11  ;;  %v268_v63 = vand.u32 4294901760, %v267_v2 }
  0xf1   :  { %977 = vmatmul.mubr.f32.vlgmr.msra.gmra.mrb[0].mxu1 %v268_v63 }
  0xf2   :  { %1180 = vmatpush3.bf16.msra.mxu1 %v1508_v5  ;;  %1255 = vmatpush3.bf16.msra.mxu0 %v1510_v8 }
  0xf3   :  { %1181 = vmatprep.subr.bf16.mxu1 %v1735_v11  ;;  %1256 = vmatprep.subr.bf16.mxu0 %v1735_v11 }
  0xf4   :  { %1011 = vmatprep.mubr.msk.f32.mxu1 %vm1361_vm0, %v1734_v7 }
  0xf6   :  { %1183 = vmatpush3.bf16.msra.mxu1 %v1516_v16  ;;  %1258 = vmatpush3.bf16.msra.mxu0 %v1518_v18 }
  0xf7   :  { %1184 = vmatprep.subr.bf16.mxu1 %v1735_v11  ;;  %1259 = vmatprep.subr.bf16.mxu0 %v1735_v11 }
  0xfa   :  { %1186 = vmatpush3.bf16.msra.mxu1 %v1524_v33  ;;  %1261 = vmatpush3.bf16.msra.mxu0 %v1526_v34 }
  0xfb   :  { %1187 = vmatprep.subr.bf16.mxu1 %v1735_v11  ;;  %1262 = vmatprep.subr.bf16.mxu0 %v1735_v11 }
  0xfe   :  { %1189 = vmatpush3.bf16.msra.mxu1 %v1532_v42  ;;  %1264 = vmatpush3.bf16.msra.mxu0 %v1534_v43 }
  0xff   :  { %1190 = vmatprep.subr.bf16.mxu1 %v1735_v11  ;;  %1265 = vmatprep.subr.bf16.mxu0 %v1735_v11 }
 0x102   :  { %1192 = vmatpush3.bf16.msra.mxu1 %v1540_v0  ;;  %1267 = vmatpush3.bf16.msra.mxu0 %v1542_v1 }
 0x103   :  { %1193 = vmatprep.subr.bf16.mxu1 %v1735_v11  ;;  %1268 = vmatprep.subr.bf16.mxu0 %v1735_v11 }
 0x106   :  { %1195 = vmatpush3.bf16.msra.mxu1 %v1548_v13  ;;  %1270 = vmatpush3.bf16.msra.mxu0 %v1550_v14 }
 0x107   :  { %1196 = vmatprep.subr.bf16.mxu1 %v1735_v11  ;;  %1271 = vmatprep.subr.bf16.mxu0 %v1735_v11 }
 0x10a   :  { %1198 = vmatpush3.bf16.msra.mxu1 %v1556_v28  ;;  %1273 = vmatpush3.bf16.msra.mxu0 %v1558_v35 }
 0x10b   :  { %1199 = vmatprep.subr.bf16.mxu1 %v1735_v11  ;;  %1274 = vmatprep.subr.bf16.mxu0 %v1735_v11 }
 0x10d   :  { %1117 = vmatmul.mubr.f32.vlgmr.msra.gmra.mrb[0].mxu0 %v1607_v44 }
 0x10e   :  { %1201 = vmatpush3.bf16.msra.mxu1 %v1562_v41  ;;  %1276 = vmatpush3.bf16.msra.mxu0 %v1414_v6  ;;  %v1737_v6 = vpack.c.bf16 %v1438_v25, %v1436_v24  ;;  %v1742_v24 = vld [vmem:[#allocation6_spill] sm:$0xff] }
 0x10f   :  { %1202 = vmatprep.subr.bf16.mxu1 %v1735_v11  ;;  %1277 = vmatprep.subr.bf16.mxu0 %v1735_v11 }
 0x110   :  { %1151 = vmatprep.mubr.msk.f32.mxu0 %vm1361_vm0, %v1734_v7 }
 0x111   :  { %1012 = vmatmul.mubr.f32.vlgmr.msra.gmra.mrb[0].mxu1 %v1607_v44 }
 0x112   :  { %1204 = vmatpush3.bf16.msra.mxu1 %v1736_v62  ;;  %1279 = vmatpush3.bf16.msra.mxu0 %v1422_v12  ;;  %v1738_v12 = vpack.c.bf16 %v1443_v30, %v1441_v29  ;;  %v1744_v29 = vld [vmem:[#allocation8_spill] sm:$0xff]  ;;  %v1745_v30 = vld [vmem:[#allocation9_spill] sm:$0xff] }
 0x113   :  { %1205 = vmatprep.subr.bf16.mxu1 %v1735_v11  ;;  %1280 = vmatprep.subr.bf16.mxu0 %v1735_v11 }
 0x114   :  { %1046 = vmatprep.mubr.msk.f32.mxu1 %vm1361_vm0, %v1734_v7 }
 0x116   :  { %1207 = vmatpush3.bf16.msra.mxu1 %v1737_v6  ;;  %1282 = vmatpush3.bf16.msra.mxu0 %v1428_v17  ;;  %v1741_v17 = vld [vmem:[#allocation7_spill] sm:$0xff] }
 0x117   :  { %1208 = vmatprep.subr.bf16.mxu1 %v1735_v11  ;;  %1283 = vmatprep.subr.bf16.mxu0 %v1735_v11  ;;  %v1743_v25 = vpack.c.bf16 %v1741_v17, %v1742_v24 }
 0x11a   :  { %1210 = vmatpush3.bf16.msra.mxu1 %v1738_v12  ;;  %1285 = vmatpush3.bf16.msra.mxu0 %v1445_v31  ;;  %v1746_v31 = vld [vmem:[#allocation10_spill] sm:$0xff] }
 0x11b   :  { %1211 = vmatprep.subr.bf16.mxu1 %v1735_v11  ;;  %1286 = vmatprep.subr.bf16.mxu0 %v1735_v11 }
 0x11e   :  { %1213 = vmatpush3.bf16.msra.mxu1 %v1739_v22  ;;  %1288 = vmatpush3.bf16.msra.mxu0 %v1740_v23 }
 0x11f   :  { %1214 = vmatprep.subr.bf16.mxu1 %v1735_v11  ;;  %1289 = vmatprep.subr.bf16.mxu0 %v1735_v11 }
 0x122   :  { %1216 = vmatpush3.bf16.msra.mxu1 %v1743_v25  ;;  %1291 = vmatpush3.bf16.msra.mxu0 %v1744_v29 }
 0x123   :  { %1217 = vmatprep.subr.bf16.mxu1 %v1735_v11  ;;  %1292 = vmatprep.subr.bf16.mxu0 %v1735_v11 }
 0x126   :  { %1219 = vmatpush3.bf16.msra.mxu1 %v1218_v21  ;;  %1294 = vmatpush3.bf16.msra.mxu0 %v1745_v30 }
 0x127   :  { %1220 = vmatprep.subr.bf16.mxu1 %v1735_v11  ;;  %1295 = vmatprep.subr.bf16.mxu0 %v1735_v11 }
 0x12a   :  { %1222 = vmatpush3.bf16.msra.mxu1 %v1221_v57  ;;  %1297 = vmatpush3.bf16.msra.mxu0 %v1746_v31 }
 0x12b   :  { %1223 = vmatprep.subr.bf16.mxu1 %v1735_v11 }
 0x12d   :  { %1152 = vmatmul.mubr.f32.vlgmr.msra.gmra.mrb[0].mxu0 %v1607_v44 }
 0x12e   :  { %1225 = vmatpush3.bf16.msra.mxu1 %v1224_v55 }
 0x131   :  { %1047 = vmatmul.mubr.f32.vlgmr.msra.gmra.mrb[0].mxu1 %v1610_v51 }
 0x200   :  { %v820_v32 = vpop.f32.mrb[0].mxu0 }
 0x201   :  { %v1153_v36 = vpop.f32.mrb[1].mxu0 }
 0x204   :  { %v525_v50 = vpop.f32.mrb[0].mxu1 }
 0x205   :  { %v1298_v52 = vadd.f32 %v841_v49, %v525_v50  ;;  %v1048_v53 = vpop.f32.mrb[1].mxu1 }
 0x207   :  { %v1299_v5 = vadd.f32 %v1298_v52, %v820_v32 }
 0x209   :  { %v824_v8 = vmul.f32 0.5, %v1299_v5 }
 0x20b   :  { %1330 = vtanh.f32 %v824_v8 }
 0x215   :  { %v1331_v16 = vpop.eup %1330 }
 0x216   :  { %v826_v18 = vadd.f32 1.0, %v1331_v16 }
 0x218   :  { %v827_v33 = vmul.f32 0.5, %v826_v18 }
 0x21a   :  { %v828_v34 = vmul.f32 %v1299_v5, %v827_v33 }
 0x21c   :  { %829 = vst [vmem:[%s1715_s5] sm:$0xff] %v828_v34 }
 0x21d   :  { %834 = vsyncpa [#allocation3], 1 }

</bundles_post_ra>
